<compile_context>
chip_gen: v6e
topology: v6e:2x2x1
jax: 0.10.0
libtpu: 0.0.40
codegen_flags: <defaults>
</compile_context>

<pallas_src>
import jax
import jax.numpy as jnp
from jax.experimental import pallas as pl
from jax.experimental.pallas import tpu as pltpu


# ----------------------------------------------------------------------------
# Pallas kernel: fused broadcast + softmax(dim=1) over the 2x2 global weights
# ----------------------------------------------------------------------------
def _gcm_softmax_kernel(w_ref, o_ref):
    """w_ref: (4,) f32 in SMEM = [w00, w01, w10, w11] (row-major global_weights).
    o_ref: (TR, TL) f32 output block; global row r = ((b*2 + i)*2 + j), so
           r % 4 == 2*i + j (TR is a multiple of 8, so the block-local row
           index has the same residue mod 4 as the global row).
    """
    w00 = w_ref[0]
    w01 = w_ref[1]
    w10 = w_ref[2]
    w11 = w_ref[3]

    TR, TL = o_ref.shape

    # All per-row work happens on a thin (TR, 1) column.
    rows = jax.lax.broadcasted_iota(jnp.int32, (TR, 1), 0)
    i_idx = jax.lax.shift_right_logical(rows, 1) & 1   # torch dim=1 index
    j_idx = rows & 1                                    # torch dim=2 index

    top = jnp.where(j_idx == 0, w00, w01)               # w[0, j]
    bot = jnp.where(j_idx == 0, w10, w11)               # w[1, j]

    # softmax([a, b])[0] = sigmoid(a - b); softmax([a, b])[1] = 1 - that.
    s = 1.0 / (1.0 + jnp.exp(bot - top))                 # (TR, 1), TR exps total
    col = jnp.where(i_idx == 0, s, 1.0 - s)              # (TR, 1)

    # Pure lane-broadcast store of the tile.
    o_ref[...] = jnp.broadcast_to(col, (TR, TL))


def _round_up(x, m):
    return ((x + m - 1) // m) * m


# ----------------------------------------------------------------------------
# Wrapper: matches gcm_layers(input_width, input_height).forward(x)
# ----------------------------------------------------------------------------
def make_gcm_forward(input_width, input_height, *, max_tr=256, max_tl=2048):
    @jax.jit
    def forward(global_weights, x):
        batch = x.shape[0]                      # x is only used for its batch size
        R = batch * 2 * 2
        L = input_width * input_height

        # Lane-dense, (8,128)-aligned padded layout.
        TL = max_tl if L >= max_tl else _round_up(L, 128)
        L_pad = _round_up(L, TL)
        TR = min(_round_up(R, 8), max_tr)
        R_pad = _round_up(_round_up(R, 8), TR)
        grid = (R_pad // TR, L_pad // TL)       # (1, 1) at the test shape

        out_flat = pl.pallas_call(
            _gcm_softmax_kernel,
            out_shape=jax.ShapeDtypeStruct((R_pad, L_pad), jnp.float32),
            grid_spec=pltpu.PrefetchScalarGridSpec(
                num_scalar_prefetch=1,          # (4,) weights live in SMEM
                grid=grid,
                in_specs=[],
                out_specs=pl.BlockSpec((TR, TL), lambda i, j, w: (i, j)),
            ),
            compiler_params=pltpu.CompilerParams(
                dimension_semantics=("parallel", "parallel"),
            ),
        )(global_weights.astype(jnp.float32).reshape(4))

        # Strip padding (no-op at the test shape) and restore PyTorch layout.
        out = out_flat[:R, :L]
        return out.reshape(batch, 2, 2, input_width, input_height)

    return forward


# ----------------------------------------------------------------------------
# Pure-JAX reference (mirrors the PyTorch forward exactly)
# ----------------------------------------------------------------------------
def gcm_reference(global_weights, x, input_width, input_height):
    batch = x.shape[0]
    aw = jnp.broadcast_to(
        global_weights[None, :, :, None, None],
        (batch, 2, 2, input_width, input_height),
    )
    return jax.nn.softmax(aw, axis=1)


if __name__ == "__main__":
    key = jax.random.PRNGKey(0)
    kw, kx = jax.random.split(key)

    batch, channels = 2, 4
    input_width, input_height = 16, 16

    # Parameter: eye(2) in the module; perturb so the softmax is exercised.
    global_weights = jnp.eye(2, dtype=jnp.float32) + 0.1 * jax.random.normal(
        kw, (2, 2), jnp.float32
    )
    x = jax.random.normal(kx, (batch, channels, input_width, input_height), jnp.float32)

    forward = make_gcm_forward(input_width, input_height)
    y = forward(global_weights, x)
    y = jax.block_until_ready(y)

    assert y.shape == (batch, 2, 2, input_width, input_height), y.shape
    assert bool(jnp.all(jnp.isfinite(y)))
    assert bool(jnp.all((y >= 0.0) & (y <= 1.0)))            # softmax range
    assert bool(jnp.allclose(jnp.sum(y, axis=1), 1.0, atol=1e-5))

    y_ref = gcm_reference(global_weights, x, input_width, input_height)
    assert bool(jnp.allclose(y, y_ref, atol=1e-5, rtol=1e-5))

    print("KERNEL_OK")
</pallas_src>

<mosaic_0001>
module attributes {stable_mosaic.version = 11 : i64} {
  func.func @_gcm_softmax_kernel(%arg0: i32, %arg1: i32, %arg2: memref<4xf32, #tpu.memory_space<smem>>, %arg3: memref<8x256xf32, #tpu.memory_space<vmem>>) attributes {dimension_semantics = [#tpu.dimension_semantics<parallel>, #tpu.dimension_semantics<parallel>], iteration_bounds = array<i64: 1, 1>, scalar_prefetch = 1 : i64, scratch_operands = 0 : i64, tpu.core_type = #tpu.core_type<tc>, window_params = [{transform_indices = @transform_0, window_bounds = array<i64: 8, 256>}]} {
    %c0 = arith.constant 0 : index
    %0 = memref.load %arg2[%c0] : memref<4xf32, #tpu.memory_space<smem>>
    %c1 = arith.constant 1 : index
    %1 = memref.load %arg2[%c1] : memref<4xf32, #tpu.memory_space<smem>>
    %c2 = arith.constant 2 : index
    %2 = memref.load %arg2[%c2] : memref<4xf32, #tpu.memory_space<smem>>
    %c3 = arith.constant 3 : index
    %3 = memref.load %arg2[%c3] : memref<4xf32, #tpu.memory_space<smem>>
    %4 = tpu.iota {dimensions = array<i32: 0>} : vector<8x1xi32>
    %c1_i32 = arith.constant 1 : i32
    %5 = vector.broadcast %c1_i32 : i32 to vector<8x1xi32>
    %6 = arith.shrui %4, %5 : vector<8x1xi32>
    %c1_i32_0 = arith.constant 1 : i32
    %7 = vector.broadcast %c1_i32_0 : i32 to vector<8x1xi32>
    %8 = arith.andi %6, %7 : vector<8x1xi32>
    %c1_i32_1 = arith.constant 1 : i32
    %9 = vector.broadcast %c1_i32_1 : i32 to vector<8x1xi32>
    %10 = arith.andi %4, %9 : vector<8x1xi32>
    %c0_i32 = arith.constant 0 : i32
    %11 = vector.broadcast %c0_i32 : i32 to vector<8x1xi32>
    %12 = arith.cmpi eq, %10, %11 : vector<8x1xi32>
    %13 = vector.broadcast %0 : f32 to vector<8x1xf32>
    %14 = vector.broadcast %1 : f32 to vector<8x1xf32>
    %15 = arith.select %12, %13, %14 : vector<8x1xi1>, vector<8x1xf32>
    %c0_i32_2 = arith.constant 0 : i32
    %16 = vector.broadcast %c0_i32_2 : i32 to vector<8x1xi32>
    %17 = arith.cmpi eq, %10, %16 : vector<8x1xi32>
    %18 = vector.broadcast %2 : f32 to vector<8x1xf32>
    %19 = vector.broadcast %3 : f32 to vector<8x1xf32>
    %20 = arith.select %17, %18, %19 : vector<8x1xi1>, vector<8x1xf32>
    %21 = arith.subf %20, %15 : vector<8x1xf32>
    %22 = math.exp %21 : vector<8x1xf32>
    %cst = arith.constant 1.000000e+00 : f32
    %23 = vector.broadcast %cst : f32 to vector<8x1xf32>
    %24 = arith.addf %23, %22 : vector<8x1xf32>
    %cst_3 = arith.constant 1.000000e+00 : f32
    %25 = vector.broadcast %cst_3 : f32 to vector<8x1xf32>
    %26 = arith.divf %25, %24 : vector<8x1xf32>
    %c0_i32_4 = arith.constant 0 : i32
    %27 = vector.broadcast %c0_i32_4 : i32 to vector<8x1xi32>
    %28 = arith.cmpi eq, %8, %27 : vector<8x1xi32>
    %cst_5 = arith.constant 1.000000e+00 : f32
    %29 = vector.broadcast %cst_5 : f32 to vector<8x1xf32>
    %30 = arith.subf %29, %26 : vector<8x1xf32>
    %31 = arith.select %28, %26, %30 : vector<8x1xi1>, vector<8x1xf32>
    %32 = vector.shape_cast %31 : vector<8x1xf32> to vector<8x1xf32>
    %33 = vector.broadcast %32 : vector<8x1xf32> to vector<8x256xf32>
    %c0_6 = arith.constant 0 : index
    %c0_7 = arith.constant 0 : index
    %34 = vector.load %arg3[%c0_6, %c0_7] : memref<8x256xf32, #tpu.memory_space<vmem>>, vector<8x256xf32>
    tpu.vector_store %arg3[%c0_6, %c0_7], %33 {strides = array<i32>} : memref<8x256xf32, #tpu.memory_space<vmem>>, vector<8x256xf32>,
    return
  }
  func.func @transform_0(%arg0: i32, %arg1: i32, %arg2: memref<4xf32, #tpu.memory_space<smem>>) -> (i32, i32) {
    %c0_i32 = arith.constant 0 : i32
    return %arg0, %arg1 : i32, i32
  }
}

</mosaic_0001>

<bundles_post_ra>
// kernel: forward.1
= control target key start
LH: loop header
LB: loop body
LE: loop exit
PB: predicated region body
PF: predicated region fallthrough
CT: control target
= control target key end

     0   :  { %s85_s0 = inlined_call_operand.vmem [shape: f32[4], index: 0, kind: input, shape index: {}]   ;;  %s86_s1 = inlined_call_operand.vmem [shape: f32[8,256], index: 1, kind: output, shape index: {}]  }
   0x1   :  { %s6_s8 = sshll.u32 %s85_s0, 4  ;;  %s7_s8 = int_to_ptr.vmem [resolvable:$true] %s6_s8 }
   0x2   :  { %s51_s9 = scalar_lea.vmem %s7_s8, 16  ;;  %p56_p1 = scmp.lt.s32.totalorder %s7_s8, %s7_s8 }
   0x3   :  { %p52_p0 = scmp.ne.s32.totalorder %s7_s8, %s51_s9  ;;  %p57_p2 = scmp.lt.s32.totalorder %s51_s9, %s51_s9 }
   0x5   :  { %p58_p3 = por %p57_p2, %p56_p1 }
   0x7   :  { %p59_p4 = pnand %p58_p3, %p52_p0 }
   0x9   :  { %62 = shalt.err (!%p59_p4)  }
   0xa   :  { %s65_s10 = smov [#allocation3]  }
   0xb   :  { %9 = dma.vmem_to_smem %s7_s8, 16, %s65_s10, [#allocation2] }
   0xc   :  { %63 = dma.done.wait [#allocation2], 16 }
   0xd   :  { %64 = vsyncadd [#allocation2], 4294967280 }
   0xe   :  { %11 = sfence }
   0xf   :  { %s12_s11 = sld [smem:[#allocation3]]  ;;  %v16_v0 = vlaneseq }
  0x10   :  { %s43_s12 = sld [smem:[#allocation3 + $0x1]] }
  0x11   :  { %s44_s13 = sld [smem:[#allocation3 + $0x2]]  ;;  %v17_v1 = vshrl.u32 %v16_v0, 7 }
  0x12   :  { %s45_s14 = sld [smem:[#allocation3 + $0x3]] }
  0x13   :  { %v20_v2 = vand.u32 1, %v17_v1  ;;  %v18_v13 = vshrl.u32 %v17_v1, 1 }
  0x15   :  { %vm21_vm0 = vcmp.eq.s32.totalorder %v20_v2, 0  ;;  %v22_v3 = vstv %s12_s11  ;;  %v19_v14 = vand.u32 1, %v18_v13 }
  0x16   :  { %v23_v4 = vstv %s43_s12 }
  0x17   :  { %v24_v5 = vsel %vm21_vm0, %v22_v3, %v23_v4  ;;  %v25_v6 = vstv %s44_s13  ;;  %vm34_vm1 = vcmp.eq.s32.totalorder %v19_v14, 0 }
  0x18   :  { %v26_v7 = vstv %s45_s14 }
  0x19   :  { %v27_v8 = vsel %vm21_vm0, %v25_v6, %v26_v7 }
  0x1a   :  { %v28_v9 = vsub.f32 %v27_v8, %v24_v5 }
  0x1c   :  { %v29_v10 = vmul.f32 1.442695, %v28_v9 }
  0x1e   :  { %47 = vpow2.f32 %v29_v10 }
  0x2b   :  { %v48_v11 = vpop.eup %47 }
  0x2c   :  { %v31_v12 = vadd.f32 1.0, %v48_v11 }
  0x2e   :  { %49 = vrcp.f32 %v31_v12 }
  0x3b   :  { %v50_v15 = vpop.eup %49 }
  0x3c   :  { %v35_v16 = vsub.f32 1.0, %v50_v15 }
  0x3e   :  { %v36_v17 = vsel %vm34_vm1, %v50_v15, %v35_v16 }
  0x3f   :  { %37 = vst [vmem:[%s86_s1] sm:$0xff] %v36_v17  ;;  %38 = vst [vmem:[%s86_s1 + $0x8] sm:$0xff] %v36_v17 }

</bundles_post_ra>
